<compile_context>
chip_gen: v6e
topology: v6e:2x2x1
jax: 0.10.0
libtpu: 0.0.40
codegen_flags: <defaults>
</compile_context>

<pallas_src>
import functools

import jax
import jax.numpy as jnp
from jax import lax
from jax.experimental import pallas as pl
from jax.experimental.pallas import tpu as pltpu

_LANE = 128  # lane width; tb is kept a multiple of this for lane-dense stores


# --------------------------------------------------------------------------- #
# Tiling / VMEM sizing helpers
# --------------------------------------------------------------------------- #

def _round_up(x, m):
    return ((x + m - 1) // m) * m


def _vmem_capacity_bytes():
    """Physical VMEM of the current TPU; conservative (v7x-sized) fallback."""
    try:
        info = pltpu.get_tpu_info()
        cap = getattr(info, "vmem_capacity_bytes", None)
        if cap:
            return int(cap)
    except Exception:
        pass
    return 64 * 1024 * 1024


def _pick_vmem_limit():
    cap = _vmem_capacity_bytes()
    # Conservative ask: at most half of physical VMEM and never above 48 MiB
    # (v7x has only 64 MiB/TC), never below 32 MiB (overrides v5e's 16 MiB
    # scoped default so large tiles still compile there).
    return int(min(48 << 20, max(32 << 20, cap // 2)))


def _choose_block_rows(n, c, in_dtype, vmem_limit):
    """Largest 128-multiple row tile that fits a conservative VMEM budget.

    Only called for n > 128; the result is guaranteed to be in [128, n].
    """
    itemsize = jnp.dtype(in_dtype).itemsize
    # Per-row VMEM: double-buffered native-dtype logits block, ~5 live f32
    # (tb, C) temporaries in the body (x_f32, x-m, exp, one-hot select, slack),
    # a double-buffered lane-padded (tb, 1) int32 targets block (512 B/row each),
    # and the (negligible, lane-dense) output block.
    per_row = c * (2 * itemsize + 5 * 4) + 2 * 512 + 8
    budget = int(vmem_limit * 0.6)
    tb = budget // max(per_row, 1)
    # Keep the logits double-buffer itself <= ~12 MiB; >=512-row tiles already sit
    # at ~85% of HBM roofline, bigger tiles only add spill risk on v7x.
    tb = min(tb, (12 << 20) // max(2 * c * itemsize, 1))
    # Make the single "parallel" grid axis have >= ~8 steps where N allows it
    # (2 TCs on v7x + pipeline overlap).
    tb = min(tb, _round_up(pl.cdiv(n, 8), _LANE))
    tb = max(_LANE, min(tb, 2048))
    # TODO(synk): for extremely large class counts (C ~> 30k f32) even a 128-row
    # tile overflows VMEM; that regime needs a class-tiled / online-softmax grid.
    return (tb // _LANE) * _LANE


# --------------------------------------------------------------------------- #
# Kernel
# --------------------------------------------------------------------------- #

def _focal_pow(base, gamma):
    """base**gamma with integer-gamma specialization (VPU multiplies, no EUP pow)."""
    g = float(gamma)
    if g == 0.0:
        return jnp.ones_like(base)
    if g.is_integer() and 1.0 <= g <= 8.0:
        r = base
        for _ in range(int(g) - 1):
            r = r * base
        return r
    # NOTE: if a custom VJP is ever added, clamp `base` with a small epsilon here
    # to avoid NaN gradients of pow at base == 0 for non-integer gamma.
    return jnp.power(base, g)


def _focal_loss_kernel(logits_ref, targets_ref, out_ref, *, gamma):
    # Native-dtype load, single in-register upcast to f32.
    x = logits_ref[...].astype(jnp.float32)                 # (TB, C)
    t = targets_ref[...]                                    # (TB, 1) int32
    tb, c = x.shape

    # Row max for numerical stability.  It stays a narrow column on purpose:
    # it cancels out of ce analytically, so it is never needed lane-dense.
    m = jnp.max(x, axis=-1, keepdims=True)                  # (TB, 1)
    xm = x - m                                               # (TB, C)
    e = jnp.exp(xm)                                          # (TB, C)

    # One-hot select of the (max-shifted) target logit.  (1, C) iota broadcasts
    # against the (TB, 1) targets column -- no full-size (TB, C) iota.
    class_ids = lax.broadcasted_iota(jnp.int32, (1, c), 1)  # (1, C)
    tgt_xm = jnp.where(class_ids == t, xm, 0.0)              # (TB, C)

    # Lane reductions on the otherwise-idle MXU: contracting the class axis of
    # both (TB, C) operands against a (1, C) ones vector yields (1, TB) results
    # that are already lane-dense, so the whole epilogue and the store run 128
    # lanes wide and no (TB, 1) -> (1, TB) relayout is ever needed.
    ones_row = jnp.ones((1, c), jnp.float32)
    dn = (((1,), (1,)), ((), ()))                            # contract class axis of both
    sum_e = lax.dot_general(ones_row, e, dn,
                            preferred_element_type=jnp.float32)      # (1, TB)
    tgt_shift = lax.dot_general(ones_row, tgt_xm, dn,
                                preferred_element_type=jnp.float32)  # (1, TB)

    # ce = logsumexp(x) - x[target] = log(sum_e) - (x[target] - m); the max m
    # cancels.  ce >= 0 by construction; the clamp kills any rounding negatives.
    ce = jnp.maximum(jnp.log(sum_e) - tgt_shift, 0.0)        # (1, TB)
    p_t = jnp.exp(-ce)                                        # prob of target class
    base = jnp.maximum(1.0 - p_t, 0.0)                        # avoid pow(negative)
    out_ref[...] = _focal_pow(base, gamma) * ce               # (1, TB) lane-dense store


# --------------------------------------------------------------------------- #
# Wrapper
# --------------------------------------------------------------------------- #

def focal_loss(logits, targets, gamma, reduction="none", block_rows=None):
    """Pallas TPU focal loss. logits: (N, C) float (any fp dtype), targets: (N,) int."""
    assert reduction in ("none", "sum", "mean")
    n, c = logits.shape
    targets2d = targets.reshape(n, 1).astype(jnp.int32)

    vmem_limit = _pick_vmem_limit()
    if n <= _LANE:
        # Tiny batch: a single block exactly equal to the array dims.
        tb = n
    elif block_rows is not None:
        assert block_rows % _LANE == 0 and block_rows > 0, \
            "block_rows must be a positive multiple of 128"
        tb = min(block_rows, (n // _LANE) * _LANE)
    else:
        tb = _choose_block_rows(n, c, logits.dtype, vmem_limit)

    num_blocks = pl.cdiv(n, tb)
    grid = (num_blocks,)
    kernel = functools.partial(_focal_loss_kernel, gamma=float(gamma))

    itemsize = jnp.dtype(logits.dtype).itemsize
    cost = pl.CostEstimate(
        flops=int(10 * n * c),                      # cast/sub/cmp/select/max + 2 MXU dots
        transcendentals=int(n * c + 2 * n),         # exp per element + log/exp epilogue
        bytes_accessed=int(n * c * itemsize + n * 4 + num_blocks * tb * 4),
    )

    out = pl.pallas_call(
        kernel,
        out_shape=jax.ShapeDtypeStruct((num_blocks, 1, tb), jnp.float32),
        grid=grid,
        in_specs=[
            pl.BlockSpec((tb, c), lambda i: (i, 0)),       # logits, native dtype
            pl.BlockSpec((tb, 1), lambda i: (i, 0)),       # targets column, int32
        ],
        # Lane-dense output: (None, 1, tb) block -> kernel sees (1, tb); the
        # leading grid dim is squeezed.  Stores are unmasked full-lane vst.
        out_specs=pl.BlockSpec((None, 1, tb), lambda i: (i, 0, 0)),
        compiler_params=pltpu.CompilerParams(
            dimension_semantics=("parallel",),
            vmem_limit_bytes=int(vmem_limit),
        ),
        cost_estimate=cost,
    )(logits, targets2d)

    # Drop padded tail rows, then finish the (tiny) reduction outside the kernel:
    # grid stays fully parallel and the result is exact w.r.t. padding.
    per_sample = out.reshape(-1)[:n]
    if reduction == "sum":
        return jnp.sum(per_sample)
    if reduction == "mean":
        return jnp.mean(per_sample)
    return per_sample


class FocalLoss:
    """Thin module-like wrapper mirroring the PyTorch FocalLoss interface."""

    def __init__(self, gamma, reduction="none"):
        assert reduction in ("none", "sum", "mean")
        self.gamma = gamma
        self.reduction = reduction

    def __call__(self, input_logits, targets):
        return focal_loss(input_logits, targets, self.gamma, self.reduction)


# --------------------------------------------------------------------------- #
# Pure-JAX reference & self-test
# --------------------------------------------------------------------------- #

def _focal_loss_ref(logits, targets, gamma, reduction="none"):
    logits = logits.astype(jnp.float32)
    logp = jax.nn.log_softmax(logits, axis=-1)
    ce = -jnp.take_along_axis(logp, targets.reshape(-1, 1).astype(jnp.int32), axis=-1)[:, 0]
    p_t = jnp.exp(-ce)
    loss = (1.0 - p_t) ** gamma * ce
    if reduction == "sum":
        return loss.sum(axis=-1)
    if reduction == "mean":
        return loss.mean(axis=-1)
    return loss


if __name__ == "__main__":
    key = jax.random.PRNGKey(0)
    k_logits, k_targets = jax.random.split(key)

    N, C = 16, 16          # 16 datapoints, 16 classes
    gamma = 2.0

    logits = jax.random.normal(k_logits, (N, C), dtype=jnp.float32)
    targets = jax.random.randint(k_targets, (N,), 0, C, dtype=jnp.int32)

    # reduction='none' (module default)
    loss_none = jax.block_until_ready(focal_loss(logits, targets, gamma, "none"))
    ref_none = _focal_loss_ref(logits, targets, gamma, "none")
    assert loss_none.shape == (N,)
    assert jnp.allclose(loss_none, ref_none, atol=1e-5, rtol=1e-5)

    # reduction='mean' / 'sum'
    fl_mean = FocalLoss(gamma, "mean")
    loss_mean = jax.block_until_ready(fl_mean(logits, targets))
    assert jnp.allclose(loss_mean, _focal_loss_ref(logits, targets, gamma, "mean"),
                        atol=1e-5, rtol=1e-5)

    loss_sum = jax.block_until_ready(focal_loss(logits, targets, gamma, "sum"))
    assert jnp.allclose(loss_sum, _focal_loss_ref(logits, targets, gamma, "sum"),
                        atol=1e-4, rtol=1e-5)

    # Native bf16 logits: half the HBM traffic, f32 math inside the kernel.
    logits_bf16 = logits.astype(jnp.bfloat16)
    loss_bf16 = jax.block_until_ready(focal_loss(logits_bf16, targets, gamma, "none"))
    ref_bf16 = _focal_loss_ref(logits_bf16.astype(jnp.float32), targets, gamma, "none")
    assert jnp.allclose(loss_bf16, ref_bf16, atol=1e-4, rtol=1e-4)

    # Multi-block grid + non-divisible tail block + non-integer gamma.
    N2, C2 = 200, 48
    logits2 = jax.random.normal(jax.random.PRNGKey(1), (N2, C2), dtype=jnp.float32)
    targets2 = jax.random.randint(jax.random.PRNGKey(2), (N2,), 0, C2, dtype=jnp.int32)
    loss2 = jax.block_until_ready(focal_loss(logits2, targets2, 1.5, "mean", block_rows=128))
    assert jnp.allclose(loss2, _focal_loss_ref(logits2, targets2, 1.5, "mean"),
                        atol=1e-5, rtol=1e-5)

    print("KERNEL_OK")
</pallas_src>

<mosaic_0001>
module attributes {stable_mosaic.version = 11 : i64} {
  func.func @_focal_loss_kernel(%arg0: i32, %arg1: memref<16x16xf32, #tpu.memory_space<vmem>>, %arg2: memref<16x1xi32, #tpu.memory_space<vmem>>, %arg3: memref<1x1x16xf32, #tpu.memory_space<vmem>>) attributes {dimension_semantics = [#tpu.dimension_semantics<parallel>], iteration_bounds = array<i64: 1>, scalar_prefetch = 0 : i64, scratch_operands = 0 : i64, tpu.core_type = #tpu.core_type<tc>, window_params = [{transform_indices = @transform_0, window_bounds = array<i64: 16, 16>}, {transform_indices = @transform_1, window_bounds = array<i64: 16, 1>}, {transform_indices = @transform_2, window_bounds = array<i64: 1, 1, 16>}]} {
    %c0 = arith.constant 0 : index
    %c0_0 = arith.constant 0 : index
    %0 = vector.load %arg1[%c0, %c0_0] : memref<16x16xf32, #tpu.memory_space<vmem>>, vector<16x16xf32>
    %c0_1 = arith.constant 0 : index
    %c0_2 = arith.constant 0 : index
    %1 = vector.load %arg2[%c0_1, %c0_2] : memref<16x1xi32, #tpu.memory_space<vmem>>, vector<16x1xi32>
    %cst = arith.constant dense<0xFF800000> : vector<16xf32>
    %2 = vector.multi_reduction <maximumf>, %0, %cst [1] : vector<16x16xf32> to vector<16xf32>
    %3 = vector.shape_cast %2 : vector<16xf32> to vector<16x1xf32>
    %4 = vector.broadcast %3 : vector<16x1xf32> to vector<16x16xf32>
    %5 = arith.subf %0, %4 : vector<16x16xf32>
    %6 = math.exp %5 : vector<16x16xf32>
    %7 = tpu.iota {dimensions = array<i32: 1>} : vector<1x16xi32>
    %8 = vector.broadcast %7 : vector<1x16xi32> to vector<16x16xi32>
    %9 = vector.broadcast %1 : vector<16x1xi32> to vector<16x16xi32>
    %10 = arith.cmpi eq, %8, %9 : vector<16x16xi32>
    %cst_3 = arith.constant 0.000000e+00 : f32
    %11 = vector.broadcast %cst_3 : f32 to vector<16x16xf32>
    %12 = arith.select %10, %5, %11 : vector<16x16xi1>, vector<16x16xf32>
    %cst_4 = arith.constant 1.000000e+00 : f32
    %13 = vector.broadcast %cst_4 : f32 to vector<1x16xf32>
    %cst_5 = arith.constant dense<0.000000e+00> : vector<1x16xf32>
    %14 = tpu.matmul %13, %6, %cst_5 {dimension_numbers = #tpu.dot_dimension_numbers<[1], [1], [0], [0], [0, 0, 1, 0], [], []>} : vector<1x16xf32>, vector<16x16xf32>, vector<1x16xf32> -> vector<1x16xf32>
    %cst_6 = arith.constant dense<0.000000e+00> : vector<1x16xf32>
    %15 = tpu.matmul %13, %12, %cst_6 {dimension_numbers = #tpu.dot_dimension_numbers<[1], [1], [0], [0], [0, 0, 1, 0], [], []>} : vector<1x16xf32>, vector<16x16xf32>, vector<1x16xf32> -> vector<1x16xf32>
    %16 = math.log %14 : vector<1x16xf32>
    %17 = arith.subf %16, %15 : vector<1x16xf32>
    %cst_7 = arith.constant 0.000000e+00 : f32
    %18 = vector.broadcast %cst_7 : f32 to vector<1x16xf32>
    %19 = arith.maximumf %17, %18 : vector<1x16xf32>
    %cst_8 = arith.constant 0.000000e+00 : f32
    %20 = vector.broadcast %cst_8 : f32 to vector<1x16xf32>
    %21 = arith.subf %20, %19 : vector<1x16xf32>
    %22 = math.exp %21 : vector<1x16xf32>
    %cst_9 = arith.constant 1.000000e+00 : f32
    %23 = vector.broadcast %cst_9 : f32 to vector<1x16xf32>
    %24 = arith.subf %23, %22 : vector<1x16xf32>
    %cst_10 = arith.constant 0.000000e+00 : f32
    %25 = vector.broadcast %cst_10 : f32 to vector<1x16xf32>
    %26 = arith.maximumf %24, %25 : vector<1x16xf32>
    %27 = arith.mulf %26, %26 : vector<1x16xf32>
    %28 = arith.mulf %27, %19 : vector<1x16xf32>
    %c0_11 = arith.constant 0 : index
    %c0_12 = arith.constant 0 : index
    %c0_13 = arith.constant 0 : index
    %29 = vector.load %arg3[%c0_11, %c0_12, %c0_13] : memref<1x1x16xf32, #tpu.memory_space<vmem>>, vector<1x1x16xf32>
    %30 = vector.shape_cast %29 : vector<1x1x16xf32> to vector<1x16xf32>
    %31 = vector.shape_cast %28 : vector<1x16xf32> to vector<1x1x16xf32>
    tpu.vector_store %arg3[%c0_11, %c0_12, %c0_13], %31 {strides = array<i32>} : memref<1x1x16xf32, #tpu.memory_space<vmem>>, vector<1x1x16xf32>,
    return
  }
  func.func @transform_0(%arg0: i32) -> (i32, i32) {
    %c0_i32 = arith.constant 0 : i32
    %c0_i32_0 = arith.constant 0 : i32
    return %arg0, %c0_i32 : i32, i32
  }
  func.func @transform_1(%arg0: i32) -> (i32, i32) {
    %c0_i32 = arith.constant 0 : i32
    %c0_i32_0 = arith.constant 0 : i32
    return %arg0, %c0_i32 : i32, i32
  }
  func.func @transform_2(%arg0: i32) -> (i32, i32, i32) {
    %c0_i32 = arith.constant 0 : i32
    %c0_i32_0 = arith.constant 0 : i32
    %c0_i32_1 = arith.constant 0 : i32
    return %arg0, %c0_i32, %c0_i32_0 : i32, i32, i32
  }
}

</mosaic_0001>

<bundles_post_ra>
// kernel: tpu_custom_call.1
= control target key start
LH: loop header
LB: loop body
LE: loop exit
PB: predicated region body
PF: predicated region fallthrough
CT: control target
= control target key end

     0   :  { %vm16_vm0 = vcmask 130048   ;;  %v286_v4 = vmov 0   ;;  %s329_s0 = inlined_call_operand.vmem [shape: f32[16,16], index: 0, kind: input, shape index: {}]   ;;  %s330_s1 = inlined_call_operand.vmem [shape: s32[16,1], index: 1, kind: input, shape index: {}]   ;;  %s331_s2 = inlined_call_operand.hbm [shape: f32[1,1,16], index: 2, kind: output, shape index: {}]  }
   0x1   :  { %v13_v0 = vld [vmem:[%s329_s0 + $0x8] sm:$0xff]  ;;  %v12_v1 = vld [vmem:[%s329_s0] sm:$0xff]  ;;  %254 = vset.pattern.permute.xlu1 %v286_v4  ;;  %255 = vset.pattern.permute.xlu0 %v286_v4 }
   0x2   :  { %v15_v2 = vld [vmem:[%s330_s1 + $0x8] sm:$0xff]  ;;  %v20_v3 = vsel %vm16_vm0, %v13_v0, -inf }
   0x3   :  { %7 = vsyncpa [#allocation3], 0  ;;  %21 = vmax.xlane.f32.xlu0 %v20_v3  ;;  %35 = vperm.xlu1 %254, %v15_v2   ;;  %v17_v5 = vsel %vm16_vm0, %v12_v1, -inf  ;;  %v14_v6 = vld [vmem:[%s330_s1] sm:$0xff]  ;;  %v287_v7 = vmov 0.0   ;;  %vm288_vm1 = vmmov 0   ;;  %v29_v8 = vlaneseq }
   0x4   :  { %242 = vmatprep.subr.mxu1 %v287_v7  ;;  %235 = vmatprep.subr.mxu0 %v287_v7  ;;  %v289_v20 = vmov 1.0   ;;  %s290_s0 = smov [#allocation2]   ;;  %vm207_vm4 = vcmask 122880  }
   0x5   :  { %239 = vmatprep.mubr.msk.f32.mxu0 %vm288_vm1, %v287_v7  ;;  %246 = vmatprep.mubr.msk.f32.mxu1 %vm288_vm1, %v287_v7  ;;  %v30_v10 = vand.u32 127, %v29_v8  ;;  %s215_s1 = sshll.u32 %s290_s0, 4  ;;  %s216_s1 = int_to_ptr.vmem [resolvable:$true] %s215_s1 }
   0x6   :  { %s264_s17 = scalar_lea.vmem %s216_s1, 16  ;;  %s268_s18 = scalar_lea.vmem %s216_s1, 32 }
   0x7   :  { %18 = vmax.xlane.f32.xlu0 %v17_v5  ;;  %32 = vperm.xlu1 %254, %v14_v6   ;;  %p265_p0 = scmp.ne.s32.totalorder %s216_s1, %s264_s17  ;;  %p269_p1 = scmp.lt.s32.totalorder %s216_s1, %s216_s1 }
   0x8   :  { %p270_p2 = scmp.lt.s32.totalorder %s268_s18, %s264_s17 }
   0xa   :  { %p271_p3 = por %p270_p2, %p269_p1 }
   0xc   :  { %p272_p4 = pnand %p271_p3, %p265_p0 }
  0x7e   :  { %v36_v9 = vpop.permute.xlu1 %35 }
  0x7f   :  { %vm38_vm2 = vcmp.eq.s32.totalorder %v30_v10, %v36_v9 }
  0x82   :  { %v33_v13 = vpop.permute.xlu1 %32 }
  0x83   :  { %vm37_vm3 = vcmp.eq.s32.totalorder %v30_v10, %v33_v13 }
  0x8c   :  { %v22_v11 = vpop.xlane.xlu0 %21 }
  0x8d   :  { %v24_v12 = vsub.f32 %v13_v0, %v22_v11 }
  0x8f   :  { %v27_v14 = vmul.f32 1.442695, %v24_v12  ;;  %v40_v15 = vsel %vm38_vm2, %v24_v12, 0.0 }
  0x90   :  { %243 = vmatpush3.xpose.msk.msra.mxu1 %vm16_vm0, %v40_v15  ;;  %v19_v16 = vpop.xlane.xlu0 %18 }
  0x91   :  { %256 = vpow2.f32 %v27_v14  ;;  %v23_v17 = vsub.f32 %v12_v1, %v19_v16  ;;  %244 = vmatprep.subr.mxu1 %v287_v7 }
  0x93   :  { %v25_v18 = vmul.f32 1.442695, %v23_v17  ;;  %v39_v19 = vsel %vm37_vm3, %v23_v17, 0.0 }
  0x94   :  { %245 = vmatpush3.xpose.msk.msra.mxu1 %vm16_vm0, %v39_v19 }
  0x95   :  { %258 = vpow2.f32 %v25_v18 }
  0x97   :  { %247 = vmatmul.mubr.msk.f32.vlgmr.msra.gmra.mxu1 %vm16_vm0, %v289_v20 }
  0x9e   :  { %v257_v21 = vpop.eup %256 }
  0x9f   :  { %236 = vmatpush3.xpose.msk.msra.mxu0 %vm16_vm0, %v257_v21 }
  0xa0   :  { %237 = vmatprep.subr.mxu0 %v287_v7 }
  0xa2   :  { %v259_v22 = vpop.eup %258 }
  0xa3   :  { %238 = vmatpush3.xpose.msk.msra.mxu0 %vm16_vm0, %v259_v22 }
  0xa6   :  { %240 = vmatmul.mubr.msk.f32.vlgmr.msra.gmra.mxu0 %vm16_vm0, %v289_v20 }
 0x157   :  { %v192_v23 = vpop.f32.mrf.mxu1 }
 0x159   :  { %v248_v24 = vpop.f32.mrf.mxu1 }
 0x166   :  { %v116_v25 = vpop.f32.mrf.mxu0 }
 0x167   :  { %260 = vlog2.f32 %v116_v25 }
 0x168   :  { %v241_v26 = vpop.f32.mrf.mxu0 }
 0x174   :  { %v261_v27 = vpop.eup %260 }
 0x175   :  { %v197_v28 = vmul.f32 0.6931472, %v261_v27 }
 0x177   :  { %v198_v29 = vsub.f32 %v197_v28, %v192_v23 }
 0x179   :  { %v199_v30 = vmax.f32 %v198_v29, 0.0 }
 0x17b   :  { %v200_v31 = vsub.f32 0.0, %v199_v30 }
 0x17d   :  { %v201_v32 = vmul.f32 1.442695, %v200_v31 }
 0x17f   :  { %262 = vpow2.f32 %v201_v32 }
 0x18c   :  { %v263_v33 = vpop.eup %262 }
 0x18d   :  { %v203_v34 = vsub.f32 1.0, %v263_v33 }
 0x18f   :  { %v204_v35 = vmax.f32 %v203_v34, 0.0 }
 0x191   :  { %v205_v36 = vmul.f32 %v204_v35, %v204_v35 }
 0x193   :  { %v206_v37 = vmul.f32 %v205_v36, %v199_v30 }
 0x195   :  { %208 = vst.msk [vmem:[#allocation2] sm:$0x1] %vm207_vm4, %v206_v37 }
 0x196   :  { %275 = shalt.err (!%p272_p4)
}
 0x197   :  { %218 = dma.vmem_to_hbm [thread:$0]  %s216_s1, 16, %s331_s2, [#allocation3]  }
 0x198   :  { %284 = dma.done.wait [#allocation3], 16  }
 0x199   :  { %285 = vsyncadd [#allocation3], 4294967280 }
 0x19a   :  { %222 = vsyncpa [#allocation3], 1 }

</bundles_post_ra>
